<compile_context>
chip_gen: v6e
topology: v6e:2x2x1
jax: 0.10.0
libtpu: 0.0.40
codegen_flags: <defaults>
</compile_context>

<pallas_src>
import jax
import jax.numpy as jnp
from jax.experimental import pallas as pl
from jax.experimental.pallas import tpu as pltpu


def _round_up(n, m):
    return ((n + m - 1) // m) * m


def _pick_block_b(B, block_b):
    """Largest multiple-of-8 divisor of B <= min(block_b, max(8, B//2)).

    Falls back to the full batch (always a legal full-extent block) when no
    such divisor exists (e.g. odd batch sizes).
    """
    cap = min(block_b, max(8, B // 2), B)
    for cand in range(cap - cap % 8, 7, -8):
        if B % cand == 0:
            return cand
    return B


def encoder_kernel(x_ref, w1_ref, b1_ref, w2_ref, b2_ref, eps_ref, out_ref):
    L = eps_ref.shape[-1]

    # fc1 + tanh : cast x to bf16 in-kernel (cheap VPU pack), ragged K=513 on
    # the MXU (Mosaic masks the tail), f32 accumulate, f32 tanh on the EUP.
    xb = x_ref[...].astype(w1_ref.dtype)                       # [B, F] bf16
    h = jnp.tanh(
        jnp.dot(xb, w1_ref[...], preferred_element_type=jnp.float32)
        + b1_ref[...]                                           # [1, H] f32 broadcast
    )                                                           # [B, H] f32

    # Fused fc_mean / fc_log_var : single [H, 2L] matmul, bf16 operands.
    mv = (jnp.dot(h.astype(w2_ref.dtype), w2_ref[...],
                  preferred_element_type=jnp.float32)
          + b2_ref[...])                                        # [B, 2L] f32
    mean = mv[:, :L]                                            # [B, L]
    log_var = mv[:, L:]                                         # [B, L]

    # Reparameterization: z = mean + exp(0.5 * log_var) * eps  (f32, exp on EUP)
    z = mean + jnp.exp(0.5 * log_var) * eps_ref[...]            # [B, L]

    # Single lane-dense store: [mean | log_var | z | zero-pad] -> [B, 128].
    pieces = [mv, z]
    pad_w = out_ref.shape[-1] - 3 * L
    if pad_w > 0:
        pieces.append(jnp.zeros((z.shape[0], pad_w), dtype=jnp.float32))
    out_ref[...] = jnp.concatenate(pieces, axis=1).astype(out_ref.dtype)


def simple_encoder_forward(x, params, eps, *, block_b=512):
    """x: [B, F] float32; params: dict (see init_params); eps: [B, L] float32.

    Returns (z, mean, log_var), each [B, L] float32.
    """
    B, F_in = x.shape
    Fw, H = params["w1"].shape
    assert Fw == F_in, "w1 must be [F, H] matching x's feature dim"
    L = params["w2"].shape[1] // 2
    out_w = _round_up(3 * L, 128)

    bb = _pick_block_b(B, block_b)
    grid = (B // bb,)

    cost = pl.CostEstimate(
        flops=2 * B * F_in * H + 2 * B * H * (2 * L),
        transcendentals=B * (H + L),                       # tanh + exp
        bytes_accessed=(x.size * 4
                        + params["w1"].size * 2 + params["b1"].size * 4
                        + params["w2"].size * 2 + params["b2"].size * 4
                        + eps.size * 4
                        + B * out_w * 4),
    )

    out = pl.pallas_call(
        encoder_kernel,
        out_shape=jax.ShapeDtypeStruct((B, out_w), jnp.float32),
        grid=grid,
        in_specs=[
            pl.BlockSpec((bb, F_in), lambda i: (i, 0)),    # x   (f32, raw, ragged lanes)
            pl.BlockSpec((F_in, H), lambda i: (0, 0)),     # w1  (bf16, ragged sublanes)
            pl.BlockSpec((1, H), lambda i: (0, 0)),        # b1  (f32)
            pl.BlockSpec((H, 2 * L), lambda i: (0, 0)),    # w2 = [wm | wv] (bf16)
            pl.BlockSpec((1, 2 * L), lambda i: (0, 0)),    # b2 = [bm | bv] (f32)
            pl.BlockSpec((bb, L), lambda i: (i, 0)),       # eps (f32)
        ],
        out_specs=pl.BlockSpec((bb, out_w), lambda i: (i, 0)),
        compiler_params=pltpu.CompilerParams(
            dimension_semantics=("parallel",)),
        cost_estimate=cost,
    )(x, params["w1"], params["b1"], params["w2"], params["b2"], eps)

    mean = out[:, :L]
    log_var = out[:, L:2 * L]
    z = out[:, 2 * L:3 * L]
    return z, mean, log_var


def init_params(key, F=513, H=128, L=32):
    """Deterministic synthetic init (uniform, roughly PyTorch-Linear-like).

    Weights stored pre-transposed ([in, out]); MXU weights in bf16, biases in
    f32; fc_mean/fc_log_var fused.  F is kept at its natural (ragged) 513 --
    no padding.  f32 master copies are kept for the reference check.
    """
    ks = jax.random.split(key, 6)

    def lin(kw, kb, fan_in, fan_out):
        bound = 1.0 / jnp.sqrt(fan_in)
        w = jax.random.uniform(kw, (fan_in, fan_out), jnp.float32, -bound, bound)
        b = jax.random.uniform(kb, (1, fan_out), jnp.float32, -bound, bound)
        return w, b

    w1, b1 = lin(ks[0], ks[1], F, H)
    wm, bm = lin(ks[2], ks[3], H, L)
    wv, bv = lin(ks[4], ks[5], H, L)

    w2 = jnp.concatenate([wm, wv], axis=1)                   # [H, 2L]
    b2 = jnp.concatenate([bm, bv], axis=1)                   # [1, 2L]

    return {
        "w1": w1.astype(jnp.bfloat16),
        "b1": b1,                                            # f32
        "w2": w2.astype(jnp.bfloat16),
        "b2": b2,                                            # f32
        "w1_f32": w1,                                        # masters for reference
        "w2_f32": w2,
    }


if __name__ == "__main__":
    F_DIM, H_DIM, L_DIM = 513, 128, 32
    BATCH = 8

    root = jax.random.PRNGKey(0)
    k_param, k_x, k_eps = jax.random.split(root, 3)

    params = init_params(k_param, F=F_DIM, H=H_DIM, L=L_DIM)
    x = jax.random.normal(k_x, (BATCH, F_DIM), dtype=jnp.float32)
    eps = jax.random.normal(k_eps, (BATCH, L_DIM), dtype=jnp.float32)

    z, mean, log_var = simple_encoder_forward(x, params, eps)
    jax.block_until_ready((z, mean, log_var))

    # (1) Tight check vs. an identically-quantized reference
    #     (bf16 MXU operands, f32 accumulation / elementwise).
    h_q = jnp.tanh(
        jnp.dot(x.astype(jnp.bfloat16), params["w1"],
                preferred_element_type=jnp.float32) + params["b1"])
    mv_q = (jnp.dot(h_q.astype(jnp.bfloat16), params["w2"],
                    preferred_element_type=jnp.float32) + params["b2"])
    mean_q, logvar_q = mv_q[:, :L_DIM], mv_q[:, L_DIM:]
    z_q = mean_q + jnp.exp(0.5 * logvar_q) * eps
    assert jnp.allclose(mean, mean_q, atol=2e-3, rtol=2e-3)
    assert jnp.allclose(log_var, logvar_q, atol=2e-3, rtol=2e-3)
    assert jnp.allclose(z, z_q, atol=2e-3, rtol=2e-3)

    # (2) Loose check vs. the full-f32 reference, bounding bf16 MXU drift
    #     relative to the original float32 PyTorch module.
    hp = jax.lax.Precision.HIGHEST
    h_f = jnp.tanh(jnp.dot(x, params["w1_f32"], precision=hp) + params["b1"])
    mv_f = jnp.dot(h_f, params["w2_f32"], precision=hp) + params["b2"]
    mean_f, logvar_f = mv_f[:, :L_DIM], mv_f[:, L_DIM:]
    z_f = mean_f + jnp.exp(0.5 * logvar_f) * eps
    assert jnp.allclose(mean, mean_f, atol=1e-1, rtol=1e-1)
    assert jnp.allclose(log_var, logvar_f, atol=1e-1, rtol=1e-1)
    assert jnp.allclose(z, z_f, atol=1e-1, rtol=1e-1)

    print("KERNEL_OK")
</pallas_src>

<mosaic_0001>
module attributes {stable_mosaic.version = 11 : i64} {
  func.func @encoder_kernel(%arg0: i32, %arg1: memref<8x513xf32, #tpu.memory_space<vmem>>, %arg2: memref<513x128xbf16, #tpu.memory_space<vmem>>, %arg3: memref<1x128xf32, #tpu.memory_space<vmem>>, %arg4: memref<128x64xbf16, #tpu.memory_space<vmem>>, %arg5: memref<1x64xf32, #tpu.memory_space<vmem>>, %arg6: memref<8x32xf32, #tpu.memory_space<vmem>>, %arg7: memref<8x128xf32, #tpu.memory_space<vmem>>) attributes {dimension_semantics = [#tpu.dimension_semantics<parallel>], iteration_bounds = array<i64: 1>, scalar_prefetch = 0 : i64, scratch_operands = 0 : i64, tpu.core_type = #tpu.core_type<tc>, window_params = [{transform_indices = @transform_0, window_bounds = array<i64: 8, 513>}, {pipeline_mode = #tpu.pipeline_mode<synchronous>, transform_indices = @transform_1, window_bounds = array<i64: 513, 128>}, {pipeline_mode = #tpu.pipeline_mode<synchronous>, transform_indices = @transform_2, window_bounds = array<i64: 1, 128>}, {pipeline_mode = #tpu.pipeline_mode<synchronous>, transform_indices = @transform_3, window_bounds = array<i64: 128, 64>}, {pipeline_mode = #tpu.pipeline_mode<synchronous>, transform_indices = @transform_4, window_bounds = array<i64: 1, 64>}, {transform_indices = @transform_5, window_bounds = array<i64: 8, 32>}, {transform_indices = @transform_6, window_bounds = array<i64: 8, 128>}]} {
    %c0 = arith.constant 0 : index
    %c0_0 = arith.constant 0 : index
    %0 = vector.load %arg1[%c0, %c0_0] : memref<8x513xf32, #tpu.memory_space<vmem>>, vector<8x513xf32>
    %1 = arith.truncf %0 : vector<8x513xf32> to vector<8x513xbf16>
    %c0_1 = arith.constant 0 : index
    %c0_2 = arith.constant 0 : index
    %2 = vector.load %arg2[%c0_1, %c0_2] : memref<513x128xbf16, #tpu.memory_space<vmem>>, vector<513x128xbf16>
    %cst = arith.constant dense<0.000000e+00> : vector<8x128xf32>
    %3 = tpu.matmul %1, %2, %cst {dimension_numbers = #tpu.dot_dimension_numbers<[1], [0], [0], [1], [0, 0, 1, 1], [], []>} : vector<8x513xbf16>, vector<513x128xbf16>, vector<8x128xf32> -> vector<8x128xf32>
    %c0_3 = arith.constant 0 : index
    %c0_4 = arith.constant 0 : index
    %4 = vector.load %arg3[%c0_3, %c0_4] : memref<1x128xf32, #tpu.memory_space<vmem>>, vector<1x128xf32>
    %5 = vector.broadcast %4 : vector<1x128xf32> to vector<8x128xf32>
    %6 = arith.addf %3, %5 : vector<8x128xf32>
    %7 = math.tanh %6 : vector<8x128xf32>
    %8 = arith.truncf %7 : vector<8x128xf32> to vector<8x128xbf16>
    %c0_5 = arith.constant 0 : index
    %c0_6 = arith.constant 0 : index
    %9 = vector.load %arg4[%c0_5, %c0_6] : memref<128x64xbf16, #tpu.memory_space<vmem>>, vector<128x64xbf16>
    %cst_7 = arith.constant dense<0.000000e+00> : vector<8x64xf32>
    %10 = tpu.matmul %8, %9, %cst_7 {dimension_numbers = #tpu.dot_dimension_numbers<[1], [0], [0], [1], [0, 0, 1, 1], [], []>} : vector<8x128xbf16>, vector<128x64xbf16>, vector<8x64xf32> -> vector<8x64xf32>
    %c0_8 = arith.constant 0 : index
    %c0_9 = arith.constant 0 : index
    %11 = vector.load %arg5[%c0_8, %c0_9] : memref<1x64xf32, #tpu.memory_space<vmem>>, vector<1x64xf32>
    %12 = vector.broadcast %11 : vector<1x64xf32> to vector<8x64xf32>
    %13 = arith.addf %10, %12 : vector<8x64xf32>
    %14 = vector.extract_strided_slice %13 {offsets = [0, 0], sizes = [8, 32], strides = [1, 1]} : vector<8x64xf32> to vector<8x32xf32>
    %15 = vector.extract_strided_slice %13 {offsets = [0, 32], sizes = [8, 32], strides = [1, 1]} : vector<8x64xf32> to vector<8x32xf32>
    %cst_10 = arith.constant 5.000000e-01 : f32
    %16 = vector.broadcast %cst_10 : f32 to vector<8x32xf32>
    %17 = arith.mulf %16, %15 : vector<8x32xf32>
    %18 = math.exp %17 : vector<8x32xf32>
    %c0_11 = arith.constant 0 : index
    %c0_12 = arith.constant 0 : index
    %19 = vector.load %arg6[%c0_11, %c0_12] : memref<8x32xf32, #tpu.memory_space<vmem>>, vector<8x32xf32>
    %20 = arith.mulf %18, %19 : vector<8x32xf32>
    %21 = arith.addf %14, %20 : vector<8x32xf32>
    %cst_13 = arith.constant 0.000000e+00 : f32
    %22 = vector.broadcast %cst_13 : f32 to vector<8x32xf32>
    %23 = tpu.concatenate %13, %21, %22 in 1 : vector<8x64xf32>, vector<8x32xf32>, vector<8x32xf32> -> vector<8x128xf32>
    %c0_14 = arith.constant 0 : index
    %c0_15 = arith.constant 0 : index
    %24 = vector.load %arg7[%c0_14, %c0_15] : memref<8x128xf32, #tpu.memory_space<vmem>>, vector<8x128xf32>
    tpu.vector_store %arg7[%c0_14, %c0_15], %23 {strides = array<i32>} : memref<8x128xf32, #tpu.memory_space<vmem>>, vector<8x128xf32>,
    return
  }
  func.func @transform_0(%arg0: i32) -> (i32, i32) {
    %c0_i32 = arith.constant 0 : i32
    %c0_i32_0 = arith.constant 0 : i32
    return %arg0, %c0_i32 : i32, i32
  }
  func.func @transform_1(%arg0: i32) -> (i32, i32) {
    %c0_i32 = arith.constant 0 : i32
    %c0_i32_0 = arith.constant 0 : i32
    %c0_i32_1 = arith.constant 0 : i32
    return %c0_i32, %c0_i32_0 : i32, i32
  }
  func.func @transform_2(%arg0: i32) -> (i32, i32) {
    %c0_i32 = arith.constant 0 : i32
    %c0_i32_0 = arith.constant 0 : i32
    %c0_i32_1 = arith.constant 0 : i32
    return %c0_i32, %c0_i32_0 : i32, i32
  }
  func.func @transform_3(%arg0: i32) -> (i32, i32) {
    %c0_i32 = arith.constant 0 : i32
    %c0_i32_0 = arith.constant 0 : i32
    %c0_i32_1 = arith.constant 0 : i32
    return %c0_i32, %c0_i32_0 : i32, i32
  }
  func.func @transform_4(%arg0: i32) -> (i32, i32) {
    %c0_i32 = arith.constant 0 : i32
    %c0_i32_0 = arith.constant 0 : i32
    %c0_i32_1 = arith.constant 0 : i32
    return %c0_i32, %c0_i32_0 : i32, i32
  }
  func.func @transform_5(%arg0: i32) -> (i32, i32) {
    %c0_i32 = arith.constant 0 : i32
    %c0_i32_0 = arith.constant 0 : i32
    return %arg0, %c0_i32 : i32, i32
  }
  func.func @transform_6(%arg0: i32) -> (i32, i32) {
    %c0_i32 = arith.constant 0 : i32
    %c0_i32_0 = arith.constant 0 : i32
    return %arg0, %c0_i32 : i32, i32
  }
}

</mosaic_0001>

<bundles_post_ra>
// kernel: tpu_custom_call.1
= control target key start
LH: loop header
LB: loop body
LE: loop exit
PB: predicated region body
PF: predicated region fallthrough
CT: control target
= control target key end

     0   :  { %11 = vsyncpa [#allocation3], 0  ;;  %s921_s0 = inlined_call_operand.vmem [shape: f32[8,513], index: 0, kind: input, shape index: {}]   ;;  %s922_s1 = inlined_call_operand.hbm [shape: bf16[513,128], index: 1, kind: input, shape index: {}]   ;;  %s923_s2 = inlined_call_operand.vmem [shape: f32[1,128], index: 2, kind: input, shape index: {}]   ;;  %s924_s3 = inlined_call_operand.vmem [shape: bf16[128,64], index: 3, kind: input, shape index: {}]   ;;  %s925_s4 = inlined_call_operand.vmem [shape: f32[1,64], index: 4, kind: input, shape index: {}]   ;;  %s926_s5 = inlined_call_operand.vmem [shape: f32[8,32], index: 5, kind: input, shape index: {}]   ;;  %s927_s6 = inlined_call_operand.hbm [shape: f32[8,128], index: 6, kind: output, shape index: {}]  }
   0x1   :  { %12 = vsyncpa [#allocation4], 0  ;;  %s820_s21 = smov [#allocation2]  }
   0x2   :  { %s20_s22 = sshll.u32 %s820_s21, 4  ;;  %s21_s22 = int_to_ptr.vmem [resolvable:$true] %s20_s22 }
   0x3   :  { %s784_s23 = scalar_lea.vmem %s21_s22, 4160  ;;  %p789_p1 = scmp.lt.s32.totalorder %s21_s22, %s21_s22 }
   0x4   :  { %p785_p0 = scmp.ne.s32.totalorder %s21_s22, %s784_s23  ;;  %p790_p2 = scmp.lt.s32.totalorder %s784_s23, %s784_s23 }
   0x6   :  { %p791_p3 = por %p790_p2, %p789_p1 }
   0x8   :  { %p792_p4 = pnand %p791_p3, %p785_p0 }
   0xa   :  { %795 = shalt.err (!%p792_p4)
}
   0xb   :  { %s821_s24 = smov 64   ;;  %s822_s25 = smov 4  }
   0xc   :  { %26 = dma.hbm_to_vmem [thread:$0]  %s922_s1, 4160, %s21_s22, [#allocation3], %s821_s24, %s821_s24, %s822_s25  }
   0xd   :  { %816 = dma.done.wait [#allocation3], 4160  }
   0xe   :  { %817 = vsyncadd [#allocation3], 4294963136  ;;  %v731_v0 = vld [vmem:[#allocation2 + $0x78] sm:$0xff]   ;;  %v735_v4 = vld [vmem:[#allocation2 + $0x70] sm:$0xff]   ;;  %vm320_vm0 = vcmask 1040384   ;;  %v823_v35 = vmov 0  }
   0xf   :  { %v732_v1 = vld [vmem:[#allocation2 + $0xf8] sm:$0xff]   ;;  %641 = vmatprep.subr.bf16.mxu0 %v731_v0  ;;  %v736_v5 = vld [vmem:[#allocation2 + $0xf0] sm:$0xff]   ;;  %v739_v8 = vld [vmem:[#allocation2 + $0x68] sm:$0xff]   ;;  %v322_v36 = vsel %vm320_vm0, 65535, %v823_v35  ;;  %v824_v41 = vmov 0.0   ;;  %vm825_vm1 = vmmov 0  }
  0x10   :  { %v733_v2 = vld [vmem:[#allocation2 + $0x38] sm:$0xff]   ;;  %663 = vmatprep.subr.bf16.mxu1 %v732_v1  ;;  %v737_v6 = vld [vmem:[#allocation2 + $0x30] sm:$0xff]   ;;  %v740_v9 = vld [vmem:[#allocation2 + $0xe8] sm:$0xff]   ;;  %vm316_vm2 = vcmask 7168   ;;  %s826_s30 = smov 32   ;;  %vm577_vm3 = vcmask 523264  }
  0x11   :  { %v734_v3 = vld [vmem:[#allocation2 + $0xb8] sm:$0xff]   ;;  %642 = vmatpush3.bf16.msra.mxu0 %v733_v2  ;;  %v738_v7 = vld [vmem:[#allocation2 + $0xb0] sm:$0xff]   ;;  %v741_v10 = vld [vmem:[#allocation2 + $0x28] sm:$0xff]   ;;  %s828_s9 = smov [#allocation5]   ;;  %vm579_vm4 = vcmask 785408  }
  0x12   :  { %664 = vmatpush3.bf16.msra.mxu1 %v734_v3  ;;  %643 = vmatprep.subr.bf16.mxu0 %v735_v4  ;;  %v742_v11 = vld [vmem:[#allocation2 + $0xa8] sm:$0xff]   ;;  %v743_v12 = vld [vmem:[#allocation2 + $0x60] sm:$0xff]   ;;  %v747_v16 = vld [vmem:[#allocation2 + $0x58] sm:$0xff]  }
  0x13   :  { %665 = vmatprep.subr.bf16.mxu1 %v736_v5  ;;  %v744_v13 = vld [vmem:[#allocation2 + $0xe0] sm:$0xff]   ;;  %v748_v17 = vld [vmem:[#allocation2 + $0xd8] sm:$0xff]   ;;  %v751_v20 = vld [vmem:[#allocation2 + $0x50] sm:$0xff]  }
  0x14   :  { %v745_v14 = vld [vmem:[#allocation2 + $0x20] sm:$0xff]   ;;  %v749_v18 = vld [vmem:[#allocation2 + $0x18] sm:$0xff]   ;;  %v752_v21 = vld [vmem:[#allocation2 + $0xd0] sm:$0xff]  }
  0x15   :  { %644 = vmatpush3.bf16.msra.mxu0 %v737_v6  ;;  %v746_v15 = vld [vmem:[#allocation2 + $0xa0] sm:$0xff]   ;;  %v750_v19 = vld [vmem:[#allocation2 + $0x98] sm:$0xff]   ;;  %v753_v22 = vld [vmem:[#allocation2 + $0x10] sm:$0xff]  }
  0x16   :  { %666 = vmatpush3.bf16.msra.mxu1 %v738_v7  ;;  %645 = vmatprep.subr.bf16.mxu0 %v739_v8  ;;  %v754_v23 = vld [vmem:[#allocation2 + $0x90] sm:$0xff]   ;;  %v755_v24 = vld [vmem:[#allocation2 + $0x48] sm:$0xff]   ;;  %v759_v28 = vld [vmem:[#allocation2 + $0x40] sm:$0xff]  }
  0x17   :  { %667 = vmatprep.subr.bf16.mxu1 %v740_v9  ;;  %v756_v25 = vld [vmem:[#allocation2 + $0xc8] sm:$0xff]   ;;  %v760_v29 = vld [vmem:[#allocation2 + $0xc0] sm:$0xff]   ;;  %v42_v33 = vld [vmem:[%s921_s0 + $0x18] sm:$0xff] }
  0x18   :  { %v757_v26 = vld [vmem:[#allocation2 + $0x8] sm:$0xff]   ;;  %v761_v30 = vld [vmem:[#allocation2] sm:$0xff]   ;;  %v47_v38 = vpack.c.bf16 %v42_v33, %v42_v33  ;;  %v41_v40 = vld [vmem:[%s921_s0 + $0x10] sm:$0xff] }
  0x19   :  { %646 = vmatpush3.bf16.msra.mxu0 %v741_v10  ;;  %v758_v27 = vld [vmem:[#allocation2 + $0x88] sm:$0xff]   ;;  %v762_v31 = vld [vmem:[#allocation2 + $0x80] sm:$0xff]   ;;  %v46_v43 = vpack.c.bf16 %v41_v40, %v41_v40  ;;  %v764_v46 = vld [vmem:[%s924_s3 + $0x38] sm:$0xff]  }
  0x1a   :  { %668 = vmatpush3.bf16.msra.mxu1 %v742_v11  ;;  %647 = vmatprep.subr.bf16.mxu0 %v743_v12  ;;  %v40_v32 = vld [vmem:[%s921_s0 + $0x8] sm:$0xff]  ;;  %v39_v34 = vld [vmem:[%s921_s0] sm:$0xff]  ;;  %v765_v48 = vld [vmem:[%s924_s3 + $0x30] sm:$0xff]  }
  0x1b   :  { %669 = vmatprep.subr.bf16.mxu1 %v744_v13  ;;  %v45_v37 = vpack.c.bf16 %v40_v32, %v40_v32  ;;  %v44_v39 = vpack.c.bf16 %v39_v34, %v39_v34  ;;  %v763_v42 = vld [vmem:[#allocation2 + $0x100] ss:$0 sps:$4 sm:$0x11]   ;;  %398 = vmatprep.mubr.bf16.mxu1 %v47_v38  ;;  %v766_v49 = vld [vmem:[%s924_s3 + $0x28] sm:$0xff]   ;;  %v768_v51 = vld [vmem:[%s924_s3 + $0x18] sm:$0xff]  }
  0x1c   :  { %v324_v44 = vand.u32 %v763_v42, %v322_v36  ;;  %v43_v45 = vld [vmem:[%s921_s0 + $0x20] sm:$0xff]  ;;  %v769_v52 = vld [vmem:[%s924_s3 + $0x10] sm:$0xff]   ;;  %v770_v53 = vld [vmem:[%s924_s3 + $0x8] sm:$0xff]  }
  0x1d   :  { %648 = vmatpush3.bf16.msra.mxu0 %v745_v14  ;;  %358 = vmatprep.mubr.bf16.mxu0 %v45_v37  ;;  %v48_v47 = vpack.c.bf16 %v43_v45, %v43_v45  ;;  %v767_v50 = vld [vmem:[%s924_s3 + $0x20] sm:$0xff]  }
  0x1e   :  { %670 = vmatpush3.bf16.msra.mxu1 %v746_v15  ;;  %649 = vmatprep.subr.bf16.mxu0 %v747_v16  ;;  %v771_v54 = vld [vmem:[%s924_s3] sm:$0xff]  }
  0x1f   :  { %671 = vmatprep.subr.bf16.mxu1 %v748_v17  ;;  %v562_v55 = vld [vmem:[%s926_s5] sm:$0xff]  ;;  %s827_s5 = smov 96  }
  0x20   :  { %564 = vrot.lane.b32.xlu0 %v562_v55, %s826_s30  ;;  %v597_v58 = vld [vmem:[%s923_s2] ss:$0 sm:$0xff] }
  0x21   :  { %650 = vmatpush3.bf16.msra.mxu0 %v749_v18  ;;  %v632_v12 = vld [vmem:[%s925_s4] ss:$0 sm:$0xff]  ;;  %s588_s4 = sshll.u32 %s828_s9, 4  ;;  %s589_s4 = int_to_ptr.vmem [resolvable:$true] %s588_s4 }
  0x22   :  { %672 = vmatpush3.bf16.msra.mxu1 %v750_v19  ;;  %651 = vmatprep.subr.bf16.mxu0 %v751_v20  ;;  %s796_s10 = scalar_lea.vmem %s589_s4, 128  ;;  %p801_p6 = scmp.lt.s32.totalorder %s589_s4, %s589_s4 }
  0x23   :  { %673 = vmatprep.subr.bf16.mxu1 %v752_v21  ;;  %p797_p5 = scmp.ne.s32.totalorder %s589_s4, %s796_s10  ;;  %p802_p7 = scmp.lt.s32.totalorder %s796_s10, %s796_s10 }
  0x25   :  { %652 = vmatpush3.bf16.msra.mxu0 %v753_v22  ;;  %p803_p8 = por %p802_p7, %p801_p6 }
  0x26   :  { %674 = vmatpush3.bf16.msra.mxu1 %v754_v23  ;;  %653 = vmatprep.subr.bf16.mxu0 %v755_v24 }
  0x27   :  { %675 = vmatprep.subr.bf16.mxu1 %v756_v25  ;;  %p804_p9 = pnand %p803_p8, %p797_p5 }
  0x29   :  { %654 = vmatpush3.bf16.msra.mxu0 %v757_v26 }
  0x2a   :  { %676 = vmatpush3.bf16.msra.mxu1 %v758_v27  ;;  %655 = vmatprep.subr.bf16.mxu0 %v759_v28 }
  0x2b   :  { %677 = vmatprep.subr.bf16.mxu1 %v760_v29 }
  0x2d   :  { %656 = vmatpush3.bf16.msra.mxu0 %v761_v30 }
  0x2e   :  { %678 = vmatpush3.bf16.msra.mxu1 %v762_v31  ;;  %696 = vmatprep.subr.bf16.mxu0 %v824_v41 }
  0x2f   :  { %702 = vmatprep.subr.bf16.mxu1 %v824_v41 }
  0x30   :  { %359 = vmatmul.mubr.bf16.vlgmr.msra.gmra.mxu0 %v44_v39 }
  0x31   :  { %399 = vmatmul.mubr.bf16.vlgmr.msra.gmra.mxu1 %v46_v43  ;;  %697 = vmatpush3.bf16.msra.mxu0 %v324_v44 }
  0x32   :  { %698 = vmatprep.mubr.msk.bf16.mxu0 %vm825_vm1, %v824_v41  ;;  %703 = vmatpush3.bf16.msra.mxu1 %v764_v46 }
  0x33   :  { %718 = vmatprep.mubr.msk.bf16.mxu1 %vm825_vm1, %v824_v41  ;;  %704 = vmatprep.subr.bf16.mxu1 %v824_v41 }
  0x36   :  { %705 = vmatpush3.bf16.msra.mxu1 %v765_v48 }
  0x37   :  { %706 = vmatprep.subr.bf16.mxu1 %v824_v41 }
  0x38   :  { %699 = vmatmul.mubr.msk.bf16.vlgmr.msra.gmra.mxu0 %vm316_vm2, %v48_v47 }
  0x3a   :  { %707 = vmatpush3.bf16.msra.mxu1 %v766_v49 }
  0x3b   :  { %708 = vmatprep.subr.bf16.mxu1 %v824_v41 }
  0x3e   :  { %709 = vmatpush3.bf16.msra.mxu1 %v767_v50 }
  0x3f   :  { %710 = vmatprep.subr.bf16.mxu1 %v824_v41 }
  0x42   :  { %711 = vmatpush3.bf16.msra.mxu1 %v768_v51 }
  0x43   :  { %712 = vmatprep.subr.bf16.mxu1 %v824_v41 }
  0x46   :  { %713 = vmatpush3.bf16.msra.mxu1 %v769_v52 }
  0x47   :  { %714 = vmatprep.subr.bf16.mxu1 %v824_v41 }
  0x4a   :  { %715 = vmatpush3.bf16.msra.mxu1 %v770_v53 }
  0x4b   :  { %716 = vmatprep.subr.bf16.mxu1 %v824_v41 }
  0x4e   :  { %717 = vmatpush3.bf16.msra.mxu1 %v771_v54 }
  0x92   :  { %v565_v20 = vpop.permute.xlu0 %564 }
  0xf0   :  { %v657_v56 = vpop.f32.mrf.mxu0 }
  0xf1   :  { %v679_v57 = vpop.f32.mrf.mxu1 }
  0xf2   :  { %v658_v59 = vpop.f32.mrf.mxu0 }
  0xf3   :  { %v680_v60 = vpop.f32.mrf.mxu1  ;;  %v659_v61 = vadd.f32 %v658_v59, %v657_v56 }
  0xf4   :  { %v660_v62 = vpop.f32.mrf.mxu0  ;;  %v681_v1 = vadd.f32 %v680_v60, %v679_v57 }
  0xf5   :  { %v682_v63 = vpop.f32.mrf.mxu1  ;;  %v361_v0 = vadd.f32 %v659_v61, %v597_v58 }
  0xf6   :  { %v661_v2 = vpop.f32.mrf.mxu0 }
  0xf7   :  { %v683_v3 = vpop.f32.mrf.mxu1  ;;  %v401_v4 = vadd.f32 %v681_v1, %v361_v0 }
  0xf8   :  { %v440_v5 = vpop.f32.mrf.mxu0 }
  0xf9   :  { %v441_v6 = vadd.f32 %v440_v5, %v401_v4 }
  0xfa   :  { %v700_v7 = vpop.f32.mrf.mxu0 }
  0xfb   :  { %772 = vtanh.f32 %v441_v6 }
  0xfc   :  { %v443_v8 = vpop.f32.mrf.mxu0 }
  0xfe   :  { %v701_v9 = vpop.f32.mrf.mxu0 }
 0x108   :  { %v773_v10 = vpop.eup %772 }
 0x109   :  { %v447_v11 = vpack.c.bf16 %v773_v10, %v773_v10 }
 0x10b   :  { %719 = vmatmul.mubr.bf16.vlgmr.msra.gmra.mxu1 %v447_v11 }
 0x1cb   :  { %v553_v13 = vpop.f32.mrf.mxu1 }
 0x1cc   :  { %v554_v14 = vadd.f32 %v632_v12, %v553_v13 }
 0x1cd   :  { %v720_v15 = vpop.f32.mrf.mxu1 }
 0x1ce   :  { %v559_v16 = vmul.f32 0.5, %v554_v14 }
 0x1cf   :  { %v556_v17 = vpop.f32.mrf.mxu1 }
 0x1d0   :  { %v560_v18 = vmul.f32 1.442695, %v559_v16 }
 0x1d1   :  { %v721_v19 = vpop.f32.mrf.mxu1 }
 0x1d2   :  { %774 = vpow2.f32 %v560_v18 }
 0x1df   :  { %v775_v21 = vpop.eup %774 }
 0x1e0   :  { %v567_v22 = vmul.f32 %v775_v21, %v565_v20 }
 0x1e2   :  { %569 = vrot.lane.b32.xlu0 %v567_v22, %s827_s5 }
 0x254   :  { %v570_v23 = vpop.permute.xlu0 %569 }
 0x255   :  { %v572_v24 = vadd.f32 %v570_v23, %v554_v14 }
 0x257   :  { %574 = vrot.lane.b32.xlu1 %v572_v24, %s821_s24 }
 0x2c9   :  { %v575_v25 = vpop.permute.xlu1 %574 }
 0x2ca   :  { %v578_v26 = vsel %vm577_vm3, %v554_v14, %v575_v25 }
 0x2cb   :  { %v580_v27 = vsel %vm579_vm4, %v578_v26, 0.0 }
 0x2cc   :  { %581 = vst [vmem:[#allocation5] sm:$0xff] %v580_v27 }
 0x2cd   :  { %807 = shalt.err (!%p804_p9)
}
 0x2ce   :  { %591 = dma.vmem_to_hbm [thread:$0]  %s589_s4, 128, %s927_s6, [#allocation4]  }
 0x2cf   :  { %818 = dma.done.wait [#allocation4], 128  }
 0x2d0   :  { %819 = vsyncadd [#allocation4], 4294967168 }
 0x2d1   :  { %595 = vsyncpa [#allocation3], 1 }
 0x2d2   :  { %596 = vsyncpa [#allocation4], 1 }

</bundles_post_ra>
